<compile_context>
chip_gen: v7x
topology: tpu7x:2x2x1
jax: 0.10.0
libtpu: 0.0.40
codegen_flags: <defaults>
</compile_context>

<pallas_src>
import functools

import jax
import jax.numpy as jnp
from jax.experimental import pallas as pl
from jax.experimental.pallas import tpu as pltpu

_LANES = 128


def _round_up(x, m):
    return ((x + m - 1) // m) * m


def _vmem_config():
    """(per-tile f32 budget bytes, scoped vmem_limit_bytes), generation-aware."""
    try:
        info = pltpu.get_tpu_info()
        vmem = getattr(info, "vmem_capacity_bytes", None)
    except Exception:
        vmem = None
    if vmem is not None and vmem >= 100 * 1024 * 1024:
        # 128 MiB-VMEM parts (v5e/v6e): larger tiles get closer to HBM roofline.
        return 6 * 1024 * 1024, 100 * 1024 * 1024
    # v7x (64 MiB physical VMEM) or unknown part: conservative sizing.
    return 2 * 1024 * 1024, 48 * 1024 * 1024


def _pick_block_rows(n, c, budget_bytes):
    rows = budget_bytes // (4 * c)
    rows = max(8, min(4096, (rows // 8) * 8))
    return int(min(rows, _round_up(n, 8)))


def _kldiv_kernel(zs_ref, zt_ref, out_ref, acc_tile_ref, acc_row_ref, *,
                  inv_temperature, n_rows, need_mask):
    i = pl.program_id(1)  # reduction-tile index ("arbitrary" axis)

    @pl.when(i == 0)
    def _():
        acc_tile_ref[...] = jnp.zeros_like(acc_tile_ref)
        acc_row_ref[...] = jnp.zeros_like(acc_row_ref)

    zs = zs_ref[...].astype(jnp.float32) * inv_temperature
    zt = zt_ref[...].astype(jnp.float32) * inv_temperature

    # Student: numerically stable logsumexp along the class (lane) axis.
    m_s = jnp.max(zs, axis=-1, keepdims=True)
    lse_s = m_s + jnp.log(jnp.sum(jnp.exp(zs - m_s), axis=-1, keepdims=True))

    # Teacher: one exp pass reused for softmax and logsumexp.
    m_t = jnp.max(zt, axis=-1, keepdims=True)
    e_t = jnp.exp(zt - m_t)
    s_t = jnp.sum(e_t, axis=-1, keepdims=True)
    inv_s = pl.reciprocal(s_t, approx=True)
    inv_s = inv_s * (2.0 - s_t * inv_s)          # one Newton step -> ~f32 exact
    lse_t = m_t + jnp.log(s_t)
    p_t = e_t * inv_s

    # sum_c p_t*(log p_t - log p_s) = sum_c p_t*(zt - zs) + (lse_s - lse_t)
    tile_term = p_t * (zt - zs)                  # (rows, C)
    row_term = lse_s - lse_t                     # (rows, 1)

    block_rows = zs_ref.shape[0]
    nstrips = block_rows // 8

    def fold(x):
        # Layout-preserving sublane fold: (rows, C) -> (rows//8, 8, C) -> (8, C).
        if nstrips == 1:
            return x
        return x.reshape(nstrips, 8, x.shape[-1]).sum(axis=0)

    def accumulate(t, r):
        acc_tile_ref[...] += fold(t)
        acc_row_ref[...] += r

    if need_mask:
        tile_idx = pl.program_id(0) * pl.num_programs(1) + i
        row_start = tile_idx * block_rows
        is_partial = row_start + block_rows > n_rows

        # Full tiles: no mask cost.
        @pl.when(jnp.logical_not(is_partial))
        def _():
            accumulate(tile_term, row_term)

        # Boundary / overhanging tiles: mask BEFORE accumulating so any
        # Inf/NaN from padded garbage rows is discarded by the select.
        @pl.when(is_partial)
        def _():
            row_ids = row_start + jax.lax.broadcasted_iota(
                jnp.int32, (block_rows, 1), 0)
            valid = row_ids < n_rows
            accumulate(jnp.where(valid, tile_term, 0.0),
                       jnp.where(valid, row_term, 0.0))
    else:
        accumulate(tile_term, row_term)

    @pl.when(i == pl.num_programs(1) - 1)
    def _():
        total = jnp.sum(acc_tile_ref[...]) + jnp.sum(acc_row_ref[...])
        # Lane-dense (1, 128) partial per core split; wrapper picks lane 0.
        out_ref[...] = jnp.full(out_ref.shape, total, dtype=out_ref.dtype)


def kldiv_loss(z_s, z_t, temperature=1.0, block_rows=None, num_core_splits=2):
    """KD KL-divergence loss via a Pallas TPU kernel.

    z_s, z_t: (N, C) logits (student / teacher), any float dtype (bf16 OK —
    do NOT pre-cast; the kernel upcasts in VMEM so HBM traffic stays narrow).
    Returns a float32 scalar = (p_t * (log p_t - log p_s)).sum(1).mean() * T^2.
    """
    assert z_s.shape == z_t.shape and z_s.ndim == 2
    n, c = z_s.shape

    tile_budget, vmem_limit = _vmem_config()
    if block_rows is None:
        block_rows = _pick_block_rows(n, c, tile_budget)
    block_rows = max(8, _round_up(int(block_rows), 8))

    num_tiles = pl.cdiv(n, block_rows)
    if num_core_splits > 1 and num_tiles >= num_core_splits:
        splits = int(num_core_splits)
    else:
        splits = 1
    tiles_per_split = pl.cdiv(num_tiles, splits)
    # Mask if the last real tile is partial OR a split has an overhanging tile.
    need_mask = (n % block_rows != 0) or (splits * tiles_per_split != num_tiles)

    last_block = num_tiles - 1

    def in_map(s, i):
        # Clamp overhanging tiles of the last split to the final real block;
        # their rows are fully masked out in-kernel.
        return (jnp.minimum(s * tiles_per_split + i, last_block), 0)

    kernel = functools.partial(
        _kldiv_kernel,
        inv_temperature=1.0 / float(temperature),
        n_rows=n,
        need_mask=need_mask,
    )

    in_spec = pl.BlockSpec((block_rows, c), in_map)

    partials = pl.pallas_call(
        kernel,
        out_shape=jax.ShapeDtypeStruct((1, splits * _LANES), jnp.float32),
        grid_spec=pltpu.PrefetchScalarGridSpec(
            num_scalar_prefetch=0,
            grid=(splits, tiles_per_split),
            in_specs=[in_spec, in_spec],
            out_specs=pl.BlockSpec((1, _LANES), lambda s, i: (0, s)),
            scratch_shapes=[
                pltpu.VMEM((8, c), jnp.float32),           # strip accumulator
                pltpu.VMEM((block_rows, 1), jnp.float32),  # lse-diff accumulator
            ],
        ),
        compiler_params=pltpu.CompilerParams(
            # Batch split across TensorCores (v7x megacore); reduction axis
            # serialized so the accumulators stay resident.
            dimension_semantics=("parallel", "arbitrary"),
            vmem_limit_bytes=vmem_limit,
        ),
    )(z_s, z_t)

    per_split = partials.reshape(splits, _LANES)[:, 0]
    scale = (float(temperature) ** 2) / float(n)
    return jnp.sum(per_split) * scale


def _reference(z_s, z_t, temperature=1.0):
    log_p_s = jax.nn.log_softmax(z_s / temperature, axis=1)
    log_p_t = jax.nn.log_softmax(z_t / temperature, axis=1)
    p_t = jnp.exp(log_p_t)
    kd = jnp.sum(p_t * (log_p_t - log_p_s), axis=1).mean()
    return kd * temperature ** 2


if __name__ == "__main__":
    key = jax.random.PRNGKey(0)
    k1, k2, k3, k4, k5, k6 = jax.random.split(key, 6)

    # Case 1: small KD logits, auto block size, single tile / single split.
    z_s = jax.random.normal(k1, (16, 128), dtype=jnp.float32)
    z_t = jax.random.normal(k2, (16, 128), dtype=jnp.float32)
    loss = kldiv_loss(z_s, z_t, temperature=4.0)
    ref = _reference(z_s, z_t, temperature=4.0)
    assert jnp.allclose(loss, ref, atol=1e-4, rtol=1e-4), (loss, ref)

    # Case 2: ragged batch + odd tile count -> boundary-only mask and a
    # clamped/zeroed overhanging tile on the second core split.
    z_s2 = jax.random.normal(k3, (20, 96), dtype=jnp.float32) * 3.0
    z_t2 = jax.random.normal(k4, (20, 96), dtype=jnp.float32) * 3.0
    loss2 = kldiv_loss(z_s2, z_t2, temperature=2.0, block_rows=8)
    ref2 = _reference(z_s2, z_t2, temperature=2.0)
    assert jnp.allclose(loss2, ref2, atol=1e-4, rtol=1e-4), (loss2, ref2)

    # Case 3: bf16 logits (no wrapper pre-cast), even 2-way split, strip fold.
    z_s3 = jax.random.normal(k5, (64, 128), dtype=jnp.float32).astype(jnp.bfloat16)
    z_t3 = jax.random.normal(k6, (64, 128), dtype=jnp.float32).astype(jnp.bfloat16)
    loss3 = kldiv_loss(z_s3, z_t3, temperature=1.0, block_rows=16)
    ref3 = _reference(z_s3.astype(jnp.float32), z_t3.astype(jnp.float32),
                      temperature=1.0)
    assert jnp.allclose(loss3, ref3, atol=1e-3, rtol=1e-3), (loss3, ref3)

    jax.block_until_ready((loss, loss2, loss3))
    print("KERNEL_OK")
</pallas_src>

<mosaic_0001>
module attributes {stable_mosaic.version = 11 : i64} {
  func.func @_kldiv_kernel(%arg0: i32, %arg1: i32, %arg2: memref<16x128xf32, #tpu.memory_space<vmem>>, %arg3: memref<16x128xf32, #tpu.memory_space<vmem>>, %arg4: memref<1x128xf32, #tpu.memory_space<vmem>>, %arg5: memref<8x128xf32, #tpu.memory_space<vmem>>, %arg6: memref<16x1xf32, #tpu.memory_space<vmem>>) attributes {dimension_semantics = [#tpu.dimension_semantics<parallel>, #tpu.dimension_semantics<arbitrary>], iteration_bounds = array<i64: 1, 1>, scalar_prefetch = 0 : i64, scratch_operands = 2 : i64, tpu.core_type = #tpu.core_type<tc>, window_params = [{transform_indices = @transform_0, window_bounds = array<i64: 16, 128>}, {transform_indices = @transform_1, window_bounds = array<i64: 16, 128>}, {transform_indices = @transform_2, window_bounds = array<i64: 1, 128>}]} {
    %c0_i32 = arith.constant 0 : i32
    %0 = arith.cmpi eq, %arg1, %c0_i32 : i32
    %1 = arith.extui %0 : i1 to i32
    %c0_i32_0 = arith.constant 0 : i32
    %2 = arith.cmpi ne, %1, %c0_i32_0 : i32
    scf.if %2 {
      %cst_21 = arith.constant 0.000000e+00 : f32
      %48 = vector.broadcast %cst_21 : f32 to vector<8x128xf32>
      %c0_22 = arith.constant 0 : index
      %c0_23 = arith.constant 0 : index
      %49 = vector.load %arg5[%c0_22, %c0_23] : memref<8x128xf32, #tpu.memory_space<vmem>>, vector<8x128xf32>
      tpu.vector_store %arg5[%c0_22, %c0_23], %48 {strides = array<i32>} : memref<8x128xf32, #tpu.memory_space<vmem>>, vector<8x128xf32>,
      %cst_24 = arith.constant 0.000000e+00 : f32
      %50 = vector.broadcast %cst_24 : f32 to vector<16x1xf32>
      %c0_25 = arith.constant 0 : index
      %c0_26 = arith.constant 0 : index
      %51 = vector.load %arg6[%c0_25, %c0_26] : memref<16x1xf32, #tpu.memory_space<vmem>>, vector<16x1xf32>
      tpu.vector_store %arg6[%c0_25, %c0_26], %50 {strides = array<i32>} : memref<16x1xf32, #tpu.memory_space<vmem>>, vector<16x1xf32>,
    } else {
    }
    %c0 = arith.constant 0 : index
    %c0_1 = arith.constant 0 : index
    %3 = vector.load %arg2[%c0, %c0_1] : memref<16x128xf32, #tpu.memory_space<vmem>>, vector<16x128xf32>
    %cst = arith.constant 2.500000e-01 : f32
    %4 = vector.broadcast %cst : f32 to vector<16x128xf32>
    %5 = arith.mulf %3, %4 : vector<16x128xf32>
    %c0_2 = arith.constant 0 : index
    %c0_3 = arith.constant 0 : index
    %6 = vector.load %arg3[%c0_2, %c0_3] : memref<16x128xf32, #tpu.memory_space<vmem>>, vector<16x128xf32>
    %cst_4 = arith.constant 2.500000e-01 : f32
    %7 = vector.broadcast %cst_4 : f32 to vector<16x128xf32>
    %8 = arith.mulf %6, %7 : vector<16x128xf32>
    %cst_5 = arith.constant dense<0xFF800000> : vector<16xf32>
    %9 = vector.multi_reduction <maximumf>, %5, %cst_5 [1] : vector<16x128xf32> to vector<16xf32>
    %10 = vector.shape_cast %9 : vector<16xf32> to vector<16x1xf32>
    %11 = vector.broadcast %10 : vector<16x1xf32> to vector<16x128xf32>
    %12 = arith.subf %5, %11 : vector<16x128xf32>
    %13 = math.exp %12 : vector<16x128xf32>
    %cst_6 = arith.constant dense<0.000000e+00> : vector<16xf32>
    %14 = vector.multi_reduction <add>, %13, %cst_6 [1] : vector<16x128xf32> to vector<16xf32>
    %15 = vector.shape_cast %14 : vector<16xf32> to vector<16x1xf32>
    %16 = math.log %15 : vector<16x1xf32>
    %17 = arith.addf %10, %16 : vector<16x1xf32>
    %cst_7 = arith.constant dense<0xFF800000> : vector<16xf32>
    %18 = vector.multi_reduction <maximumf>, %8, %cst_7 [1] : vector<16x128xf32> to vector<16xf32>
    %19 = vector.shape_cast %18 : vector<16xf32> to vector<16x1xf32>
    %20 = vector.broadcast %19 : vector<16x1xf32> to vector<16x128xf32>
    %21 = arith.subf %8, %20 : vector<16x128xf32>
    %22 = math.exp %21 : vector<16x128xf32>
    %cst_8 = arith.constant dense<0.000000e+00> : vector<16xf32>
    %23 = vector.multi_reduction <add>, %22, %cst_8 [1] : vector<16x128xf32> to vector<16xf32>
    %24 = vector.shape_cast %23 : vector<16xf32> to vector<16x1xf32>
    %25 = tpu.reciprocal %24 {approx = true} : vector<16x1xf32> -> vector<16x1xf32>
    %26 = arith.mulf %24, %25 : vector<16x1xf32>
    %cst_9 = arith.constant 2.000000e+00 : f32
    %27 = vector.broadcast %cst_9 : f32 to vector<16x1xf32>
    %28 = arith.subf %27, %26 : vector<16x1xf32>
    %29 = arith.mulf %25, %28 : vector<16x1xf32>
    %30 = math.log %24 : vector<16x1xf32>
    %31 = arith.addf %19, %30 : vector<16x1xf32>
    %32 = vector.broadcast %29 : vector<16x1xf32> to vector<16x128xf32>
    %33 = arith.mulf %22, %32 : vector<16x128xf32>
    %34 = arith.subf %8, %5 : vector<16x128xf32>
    %35 = arith.mulf %33, %34 : vector<16x128xf32>
    %36 = arith.subf %17, %31 : vector<16x1xf32>
    %c0_10 = arith.constant 0 : index
    %c0_11 = arith.constant 0 : index
    %37 = vector.load %arg5[%c0_10, %c0_11] : memref<8x128xf32, #tpu.memory_space<vmem>>, vector<8x128xf32>
    %38 = vector.shape_cast %35 : vector<16x128xf32> to vector<2x8x128xf32>
    %cst_12 = arith.constant dense<0.000000e+00> : vector<8x128xf32>
    %39 = vector.multi_reduction <add>, %38, %cst_12 [0] : vector<2x8x128xf32> to vector<8x128xf32>
    %40 = arith.addf %37, %39 : vector<8x128xf32>
    %c0_13 = arith.constant 0 : index
    %c0_14 = arith.constant 0 : index
    %41 = vector.load %arg5[%c0_13, %c0_14] : memref<8x128xf32, #tpu.memory_space<vmem>>, vector<8x128xf32>
    tpu.vector_store %arg5[%c0_13, %c0_14], %40 {strides = array<i32>} : memref<8x128xf32, #tpu.memory_space<vmem>>, vector<8x128xf32>,
    %c0_15 = arith.constant 0 : index
    %c0_16 = arith.constant 0 : index
    %42 = vector.load %arg6[%c0_15, %c0_16] : memref<16x1xf32, #tpu.memory_space<vmem>>, vector<16x1xf32>
    %43 = arith.addf %42, %36 : vector<16x1xf32>
    %c0_17 = arith.constant 0 : index
    %c0_18 = arith.constant 0 : index
    %44 = vector.load %arg6[%c0_17, %c0_18] : memref<16x1xf32, #tpu.memory_space<vmem>>, vector<16x1xf32>
    tpu.vector_store %arg6[%c0_17, %c0_18], %43 {strides = array<i32>} : memref<16x1xf32, #tpu.memory_space<vmem>>, vector<16x1xf32>,
    %c0_i32_19 = arith.constant 0 : i32
    %45 = arith.cmpi eq, %arg1, %c0_i32_19 : i32
    %46 = arith.extui %45 : i1 to i32
    %c0_i32_20 = arith.constant 0 : i32
    %47 = arith.cmpi ne, %46, %c0_i32_20 : i32
    scf.if %47 {
      %c0_21 = arith.constant 0 : index
      %c0_22 = arith.constant 0 : index
      %48 = vector.load %arg5[%c0_21, %c0_22] : memref<8x128xf32, #tpu.memory_space<vmem>>, vector<8x128xf32>
      %49 = vector.shape_cast %48 : vector<8x128xf32> to vector<1x8x128xf32>
      %cst_23 = arith.constant dense<0.000000e+00> : vector<1xf32>
      %50 = vector.multi_reduction <add>, %49, %cst_23 [1, 2] : vector<1x8x128xf32> to vector<1xf32>
      %51 = vector.shape_cast %50 : vector<1xf32> to vector<1x1x1xf32>
      %52 = vector.extract %51[0, 0, 0] : f32 from vector<1x1x1xf32>
      %c0_24 = arith.constant 0 : index
      %c0_25 = arith.constant 0 : index
      %53 = vector.load %arg6[%c0_24, %c0_25] : memref<16x1xf32, #tpu.memory_space<vmem>>, vector<16x1xf32>
      %54 = vector.shape_cast %53 : vector<16x1xf32> to vector<1x16x1xf32>
      %cst_26 = arith.constant dense<0.000000e+00> : vector<1xf32>
      %55 = vector.multi_reduction <add>, %54, %cst_26 [1, 2] : vector<1x16x1xf32> to vector<1xf32>
      %56 = vector.shape_cast %55 : vector<1xf32> to vector<1x1x1xf32>
      %57 = vector.extract %56[0, 0, 0] : f32 from vector<1x1x1xf32>
      %58 = arith.addf %52, %57 : f32
      %59 = vector.broadcast %58 : f32 to vector<1x128xf32>
      %c0_27 = arith.constant 0 : index
      %c0_28 = arith.constant 0 : index
      %60 = vector.load %arg4[%c0_27, %c0_28] : memref<1x128xf32, #tpu.memory_space<vmem>>, vector<1x128xf32>
      tpu.vector_store %arg4[%c0_27, %c0_28], %59 {strides = array<i32>} : memref<1x128xf32, #tpu.memory_space<vmem>>, vector<1x128xf32>,
    } else {
    }
    return
  }
  func.func @transform_0(%arg0: i32, %arg1: i32) -> (i32, i32) {
    %c1_i32 = arith.constant 1 : i32
    %0 = arith.muli %arg0, %c1_i32 : i32
    %1 = arith.addi %0, %arg1 : i32
    %c0_i32 = arith.constant 0 : i32
    %2 = arith.minsi %1, %c0_i32 : i32
    %c0_i32_0 = arith.constant 0 : i32
    %c0_i32_1 = arith.constant 0 : i32
    return %2, %c0_i32_0 : i32, i32
  }
  func.func @transform_1(%arg0: i32, %arg1: i32) -> (i32, i32) {
    %c1_i32 = arith.constant 1 : i32
    %0 = arith.muli %arg0, %c1_i32 : i32
    %1 = arith.addi %0, %arg1 : i32
    %c0_i32 = arith.constant 0 : i32
    %2 = arith.minsi %1, %c0_i32 : i32
    %c0_i32_0 = arith.constant 0 : i32
    %c0_i32_1 = arith.constant 0 : i32
    return %2, %c0_i32_0 : i32, i32
  }
  func.func @transform_2(%arg0: i32, %arg1: i32) -> (i32, i32) {
    %c0_i32 = arith.constant 0 : i32
    %c0_i32_0 = arith.constant 0 : i32
    return %c0_i32, %arg0 : i32, i32
  }
}

</mosaic_0001>

<bundles_post_ra>
// kernel: tpu_custom_call.1
= control target key start
LH: loop header
LB: loop body
LE: loop exit
PB: predicated region body
PF: predicated region fallthrough
CT: control target
= control target key end

     0   :  { %7 = vsyncpa [#allocation5], 0  ;;  %s378_s0 = inlined_call_operand.hbm [shape: f32[16,128], index: 0, kind: input, shape index: {}]   ;;  %s379_s1 = inlined_call_operand.hbm [shape: f32[16,128], index: 1, kind: input, shape index: {}]   ;;  %s380_s2 = inlined_call_operand.hbm [shape: f32[1,128], index: 2, kind: output, shape index: {}]  }
   0x1   :  { %8 = vsyncpa [#allocation8], 0 }
   0x2   :  { %9 = vsyncpa [#allocation6], 0  ;;  %s295_s9 = smov [#allocation4]   ;;  %s223_s13 = scalar_lea.hbm %s378_s0, 256 }
   0x3   :  { %s21_s10 = sshll.u32 %s295_s9, 4  ;;  %p224_p0 = scmp.ne.s32.totalorder %s378_s0, %s223_s13  ;;  %s22_s10 = int_to_ptr.vmem [resolvable:$true] %s21_s10 }
   0x4   :  { %p227_p1 = scmp.lt.u32.totalorder %s223_s13, %s378_s0 }
   0x6   :  { %p229_p2 = pnand %p227_p1, %p224_p0 }
   0x8   :  { %232 = shalt.err (!%p229_p2)
}
   0x9   :  { %s233_s18 = scalar_lea.vmem %s22_s10, 256  ;;  %p238_p4 = scmp.lt.s32.totalorder %s22_s10, %s22_s10 }
   0xa   :  { %p234_p3 = scmp.ne.s32.totalorder %s22_s10, %s233_s18  ;;  %p239_p5 = scmp.lt.s32.totalorder %s233_s18, %s233_s18 }
   0xc   :  { %p240_p6 = por %p239_p5, %p238_p4 }
   0xe   :  { %p241_p7 = pnand %p240_p6, %p234_p3 }
  0x10   :  { %244 = shalt.err (!%p241_p7)
}
  0x11   :  { %s296_s19 = smov 128   ;;  %s297_s20 = smov 8  }
  0x12   :  { %27 = dma.hbm_to_vmem [thread:$0]  %s378_s0, 256, %s22_s10, [#allocation5], %s296_s19, %s296_s19, %s297_s20  }
  0x13   :  { %s298_s23 = smov [#allocation7]   ;;  %s245_s27 = scalar_lea.hbm %s379_s1, 256 }
  0x14   :  { %s39_s24 = sshll.u32 %s298_s23, 4  ;;  %p246_p8 = scmp.ne.s32.totalorder %s379_s1, %s245_s27  ;;  %s40_s24 = int_to_ptr.vmem [resolvable:$true] %s39_s24 }
  0x15   :  { %p249_p9 = scmp.lt.u32.totalorder %s245_s27, %s379_s1 }
  0x17   :  { %p251_p10 = pnand %p249_p9, %p246_p8 }
  0x19   :  { %254 = shalt.err (!%p251_p10)
}
  0x1a   :  { %s255_s4 = scalar_lea.vmem %s40_s24, 256  ;;  %p260_p12 = scmp.lt.s32.totalorder %s40_s24, %s40_s24 }
  0x1b   :  { %p256_p11 = scmp.ne.s32.totalorder %s40_s24, %s255_s4  ;;  %p261_p13 = scmp.lt.s32.totalorder %s255_s4, %s255_s4 }
  0x1d   :  { %p262_p0 = por %p261_p13, %p260_p12 }
  0x1f   :  { %p263_p1 = pnand %p262_p0, %p256_p11 }
  0x21   :  { %266 = shalt.err (!%p263_p1)
}
  0x22   :  { %45 = dma.hbm_to_vmem [thread:$0]  %s379_s1, 256, %s40_s24, [#allocation8], %s296_s19, %s296_s19, %s297_s20  }
  0x23   :  { %289 = dma.done.wait [#allocation5], 256  }
  0x24   :  { %290 = vsyncadd [#allocation5], 4294967040 }
  0x25   :  { %291 = dma.done.wait [#allocation8], 256  }
  0x26   :  { %292 = vsyncadd [#allocation8], 4294967040  ;;  %v68_v0 = vld [vmem:[#allocation4] sm:$0xff]  ;;  %v72_v1 = vld [vmem:[#allocation7] sm:$0xff]  ;;  %vm65_vm0 = vcmask 7168   ;;  %v299_v24 = vmov 0.0  }
  0x27   :  { %v69_v2 = vld [vmem:[#allocation4 + $0x8] sm:$0xff]  ;;  %v340_v3 = vmul.f32 0.25, %v68_v0  ;;  %v342_v4 = vmul.f32 0.25, %v72_v1  ;;  %v73_v5 = vld [vmem:[#allocation7 + $0x8] sm:$0xff]  ;;  %66 = vst.msk [vmem:[#allocation3] sm:$0xff] %vm65_vm0, %v299_v24  ;;  %67 = vst.msk [vmem:[#allocation3 + $0x8] sm:$0xff] %vm65_vm0, %v299_v24 }
  0x28   :  { %v346_v6 = vmul.f32 0.25, %v69_v2  ;;  %v348_v7 = vmul.f32 0.25, %v73_v5  ;;  %s300_s6 = smov [#allocation9]  }
  0x29   :  { %76 = vmax.xlane.f32.xlu0 %v340_v3  ;;  %96 = vmax.xlane.f32.xlu1 %v342_v4  ;;  %v126_v50 = vsub.f32 %v342_v4, %v340_v3  ;;  %s179_s7 = sshll.u32 %s300_s6, 4  ;;  %s180_s7 = int_to_ptr.vmem [resolvable:$true] %s179_s7 }
  0x2a   :  { %v127_v53 = vsub.f32 %v348_v7, %v346_v6  ;;  %s267_s10 = scalar_lea.vmem %s180_s7, 16  ;;  %s271_s11 = scalar_lea.vmem %s180_s7, 32 }
  0x2b   :  { %p268_p2 = scmp.ne.s32.totalorder %s180_s7, %s267_s10  ;;  %p272_p3 = scmp.lt.s32.totalorder %s180_s7, %s180_s7 }
  0x2c   :  { %p273_p4 = scmp.lt.s32.totalorder %s271_s11, %s267_s10 }
  0x2d   :  { %78 = vmax.xlane.f32.xlu0 %v346_v6  ;;  %98 = vmax.xlane.f32.xlu1 %v348_v7 }
  0x2e   :  { %v136_v45 = vld [vmem:[#allocation3] sm:$0xff]  ;;  %v137_v54 = vld [vmem:[#allocation3 + $0x8] sm:$0xff]  ;;  %p274_p5 = por %p273_p4, %p272_p3 }
  0x30   :  { %p275_p6 = pnand %p274_p5, %p268_p2 }
  0xb6   :  { %v77_v8 = vpop.xlane.xlu0 %76  ;;  %v97_v9 = vpop.xlane.xlu1 %96 }
  0xb7   :  { %v80_v10 = vsub.f32 %v340_v3, %v77_v8  ;;  %v100_v11 = vsub.f32 %v342_v4, %v97_v9 }
  0xb9   :  { %v82_v12 = vmul.f32 1.442695, %v80_v10  ;;  %v102_v13 = vmul.f32 1.442695, %v100_v11 }
  0xba   :  { %v79_v14 = vpop.xlane.xlu0 %78  ;;  %v99_v15 = vpop.xlane.xlu1 %98 }
  0xbb   :  { %203 = vpow2.f32 %v82_v12  ;;  %v81_v16 = vsub.f32 %v346_v6, %v79_v14  ;;  %v101_v17 = vsub.f32 %v348_v7, %v99_v15 }
  0xbc   :  { %205 = vpow2.f32 %v102_v13 }
  0xbd   :  { %v84_v18 = vmul.f32 1.442695, %v81_v16  ;;  %v104_v19 = vmul.f32 1.442695, %v101_v17 }
  0xbf   :  { %207 = vpow2.f32 %v84_v18 }
  0xc0   :  { %209 = vpow2.f32 %v104_v19 }
  0xc5   :  { %v204_v20 = vpop.eup %203 }
  0xc6   :  { %86 = vadd.xlane.f32.xlu0 %v204_v20  ;;  %v206_v21 = vpop.eup %205 }
  0xc9   :  { %v208_v22 = vpop.eup %207 }
  0xca   :  { %106 = vadd.xlane.f32.xlu0 %v206_v21  ;;  %88 = vadd.xlane.f32.xlu1 %v208_v22  ;;  %v210_v23 = vpop.eup %209 }
  0xce   :  { %108 = vadd.xlane.f32.xlu1 %v210_v23 }
 0x153   :  { %v87_v25 = vpop.xlane.xlu0 %86 }
 0x154   :  { %211 = vlog2.f32 %v87_v25 }
 0x157   :  { %v89_v26 = vpop.xlane.xlu1 %88  ;;  %v107_v27 = vpop.xlane.xlu0 %106 }
 0x158   :  { %213 = vlog2.f32 %v89_v26 }
 0x159   :  { %215 = vrcp.f32 %v107_v27 }
 0x15a   :  { %217 = vlog2.f32 %v107_v27 }
 0x15b   :  { %v109_v28 = vpop.xlane.xlu1 %108 }
 0x15c   :  { %219 = vrcp.f32 %v109_v28 }
 0x15d   :  { %221 = vlog2.f32 %v109_v28 }
 0x15e   :  { %v212_v29 = vpop.eup %211 }
 0x15f   :  { %v91_v32 = vmul.f32 0.6931472, %v212_v29 }
 0x161   :  { %v94_v40 = vadd.f32 %v91_v32, %v77_v8 }
 0x162   :  { %v214_v30 = vpop.eup %213 }
 0x163   :  { %v216_v31 = vpop.eup %215  ;;  %v93_v37 = vmul.f32 0.6931472, %v214_v30 }
 0x164   :  { %v218_v33 = vpop.eup %217  ;;  %v112_v34 = vmul.f32 %v216_v31, %v107_v27 }
 0x165   :  { %v119_v35 = vmul.f32 0.6931472, %v218_v33  ;;  %v95_v48 = vadd.f32 %v93_v37, %v79_v14 }
 0x166   :  { %v220_v36 = vpop.eup %219  ;;  %v114_v38 = vsub.f32 2.0, %v112_v34 }
 0x167   :  { %v222_v39 = vpop.eup %221  ;;  %v122_v41 = vadd.f32 %v119_v35, %v97_v9  ;;  %v113_v42 = vmul.f32 %v220_v36, %v109_v28 }
 0x168   :  { %v116_v43 = vmul.f32 %v216_v31, %v114_v38  ;;  %v121_v44 = vmul.f32 0.6931472, %v222_v39 }
 0x169   :  { %v130_v46 = vsub.f32 %v94_v40, %v122_v41  ;;  %v115_v47 = vsub.f32 2.0, %v113_v42 }
 0x16a   :  { %v123_v49 = vadd.f32 %v121_v44, %v99_v15  ;;  %v124_v52 = vmul.f32 %v206_v21, %v116_v43 }
 0x16b   :  { %v117_v51 = vmul.f32 %v220_v36, %v115_v47  ;;  %v138_v55 = vadd.f32 %v136_v45, %v130_v46 }
 0x16c   :  { %v131_v56 = vsub.f32 %v95_v48, %v123_v49  ;;  %v128_v59 = vmul.f32 %v126_v50, %v124_v52 }
 0x16d   :  { %v125_v57 = vmul.f32 %v210_v23, %v117_v51  ;;  %141 = vst.msk [vmem:[#allocation3] sm:$0xff] %vm65_vm0, %v138_v55 }
 0x16e   :  { %v139_v58 = vadd.f32 %v137_v54, %v131_v56 }
 0x16f   :  { %v129_v60 = vmul.f32 %v127_v53, %v125_v57 }
 0x170   :  { %142 = vst.msk [vmem:[#allocation3 + $0x8] sm:$0xff] %vm65_vm0, %v139_v58 }
 0x171   :  { %v133_v61 = vadd.f32 %v129_v60, %v128_v59 }
 0x173   :  { %147 = vadd.xlane.f32.xlu0 %v133_v61 }
 0x174   :  { %v156_v62 = vld [vmem:[#allocation3] sm:$0xff] }
 0x175   :  { %v158_v0 = vsel %vm65_vm0, %v156_v62, 0.0 }
 0x177   :  { %v157_v63 = vld [vmem:[#allocation3 + $0x8] sm:$0xff] }
 0x178   :  { %v159_v1 = vsel %vm65_vm0, %v157_v63, 0.0 }
 0x179   :  { %v160_v2 = vadd.f32 %v159_v1, %v158_v0 }
 0x17b   :  { %161 = vadd.xlane.f32.xlu1 %v160_v2 }
 0x200   :  { %v148_v3 = vpop.xlane.xlu0 %147 }
 0x201   :  { %v149_v4 = vrot.slane %v148_v3, 4 }
 0x203   :  { %v150_v5 = vadd.f32 %v149_v4, %v148_v3 }
 0x205   :  { %v151_v6 = vrot.slane %v150_v5, 2 }
 0x207   :  { %v152_v7 = vadd.f32 %v151_v6, %v150_v5 }
 0x208   :  { %v162_v8 = vpop.xlane.xlu1 %161 }
 0x209   :  { %v163_v9 = vrot.slane %v162_v8, 4  ;;  %v153_v10 = vrot.slane %v152_v7, 1 }
 0x20b   :  { %v164_v11 = vadd.f32 %v163_v9, %v162_v8  ;;  %v154_v12 = vadd.f32 %v153_v10, %v152_v7 }
 0x20d   :  { %v165_v13 = vrot.slane %v164_v11, 2  ;;  %193 = vpush %v154_v12 }
 0x20f   :  { %v166_v14 = vadd.f32 %v165_v13, %v164_v11 }
 0x211   :  { %v167_v15 = vrot.slane %v166_v14, 1 }
 0x213   :  { %v168_v16 = vadd.f32 %v167_v15, %v166_v14 }
 0x215   :  { %195 = vpush %v168_v16 }
 0x23e   :  { %s194_s1 = spop %193 }
 0x246   :  { %s196_s8 = spop %195 }
 0x247   :  { %s170_s9 = sadd.f32 %s196_s8, %s194_s1 }
 0x249   :  { %v171_v17 = vstv %s170_s9 }
 0x24a   :  { %172 = vst [vmem:[#allocation9] sm:$0x1] %v171_v17 }
 0x24b   :  { %278 = shalt.err (!%p275_p6)
}
 0x24c   :  { %s279_s14 = scalar_lea.hbm %s380_s2, 16 }
 0x24d   :  { %p280_p7 = scmp.ne.s32.totalorder %s380_s2, %s279_s14  ;;  %p283_p8 = scmp.lt.u32.totalorder %s279_s14, %s380_s2 }
 0x24f   :  { %p285_p9 = pnand %p283_p8, %p280_p7 }
 0x251   :  { %288 = shalt.err (!%p285_p9)
}
 0x252   :  { %182 = dma.vmem_to_hbm [thread:$0]  %s180_s7, 16, %s380_s2, [#allocation6]  }
 0x253   :  { %293 = dma.done.wait [#allocation6], 16  }
 0x254   :  { %294 = vsyncadd [#allocation6], 4294967280 }
 0x255   :  { %186 = vsyncpa [#allocation5], 1 }
 0x256   :  { %187 = vsyncpa [#allocation8], 1 }
 0x257   :  { %188 = vsyncpa [#allocation6], 1 }

</bundles_post_ra>
